<compile_context>
chip_gen: v7x
topology: tpu7x:2x2x1
jax: 0.10.0
libtpu: 0.0.40
codegen_flags: <defaults>
</compile_context>

<pallas_src>
import functools

import numpy as np
import jax
import jax.numpy as jnp
from jax.experimental import pallas as pl
from jax.experimental.pallas import tpu as pltpu

_BLOCK_BUDGET = 12 * 1024 * 1024  # bytes of in+out block per grid step (x2 buffers)


def _interp_matrix(in_size: int, out_size: int) -> np.ndarray:
    """(out_size, in_size) linear-interp matrix, align_corners=True (PyTorch)."""
    if out_size == 1:
        src = np.zeros((1,), np.float64)
    else:
        src = np.arange(out_size, dtype=np.float64) * ((in_size - 1) / (out_size - 1))
    lo = np.clip(np.floor(src).astype(np.int64), 0, in_size - 1)
    hi = np.clip(lo + 1, 0, in_size - 1)
    frac = (src - lo).astype(np.float32)
    m = np.zeros((out_size, in_size), np.float32)
    rows = np.arange(out_size)
    m[rows, lo] += 1.0 - frac
    m[rows, hi] += frac
    return m


def _largest_divisor_leq(n: int, cap: int) -> int:
    cap = max(1, min(n, int(cap)))
    for d in range(cap, 0, -1):
        if n % d == 0:
            return d
    return 1


def _pick_tb(nc: int, plane_block_bytes: int) -> int:
    """Planes per grid step: fill the block budget, keep >=4 steps for megacore."""
    cap = min(16, max(1, _BLOCK_BUDGET // max(1, plane_block_bytes)))
    if nc >= 4:
        cap = min(cap, max(1, nc // 4))
    return _largest_divisor_leq(nc, cap)


def _pick_oh_tile(oh: int, out_row_bytes: int, in_plane_bytes: int) -> int:
    """Largest multiple-of-8 divisor of OH whose block still fits the budget."""
    if in_plane_bytes + oh * out_row_bytes <= _BLOCK_BUDGET:
        return oh
    budget_rows = max(8, (_BLOCK_BUDGET - in_plane_bytes) // max(1, out_row_bytes))
    cand = (budget_rows // 8) * 8
    while cand >= 8:
        if oh % cand == 0:
            return cand
        cand -= 8
    return oh  # no aligned divisor; fall back to full OH (always legal)


def _make_fused_width_kernel(tb: int, h: int, oh: int, compute_dtype):
    """Fast path: x block (TB*H, W), out block (TB*OH, OW)."""

    def kernel(ah_ref, awt_ref, x_ref, o_ref):
        x = x_ref[...]
        if x.dtype != compute_dtype:
            x = x.astype(compute_dtype)
        # Width pass: one large MXU matmul covering all TB planes at once.
        t = jnp.dot(x, awt_ref[...], preferred_element_type=jnp.float32)
        t = t.astype(compute_dtype)                         # (TB*H, OW)
        ah = ah_ref[...]                                    # (OH, H)
        # Height pass: one (OH, H) @ (H, OW) matmul per plane (static slices).
        for b in range(tb):
            y = jnp.dot(ah, t[b * h:(b + 1) * h, :],
                        preferred_element_type=jnp.float32)
            o_ref[b * oh:(b + 1) * oh, :] = y.astype(o_ref.dtype)

    return kernel


def _make_per_plane_kernel(tb: int, compute_dtype):
    """General path: x block (TB, H, W), out block (TB, T_OH, OW)."""

    def kernel(ah_ref, awt_ref, x_ref, o_ref):
        ah = ah_ref[...]                                    # (T_OH, H)
        awt = awt_ref[...]                                  # (W, OW)
        for b in range(tb):
            xb = x_ref[b]                                   # (H, W)
            if xb.dtype != compute_dtype:
                xb = xb.astype(compute_dtype)
            t = jnp.dot(ah, xb, preferred_element_type=jnp.float32)
            t = t.astype(compute_dtype)                     # (T_OH, W)
            y = jnp.dot(t, awt, preferred_element_type=jnp.float32)
            o_ref[b] = y.astype(o_ref.dtype)

    return kernel


@functools.partial(jax.jit, static_argnames=("up_dims",))
def up_bilinear(x: jnp.ndarray, up_dims=(True, True)) -> jnp.ndarray:
    """Forward of Up(): bilinear upsample by 2 along the selected spatial dims,
    align_corners=True, NCHW layout (matches the default nn.Upsample branch)."""
    N, C, H, W = x.shape
    OH = 2 * H if up_dims[0] else H
    OW = 2 * W if up_dims[1] else W
    NC = N * C

    compute_dtype = jnp.bfloat16 if x.dtype == jnp.bfloat16 else jnp.float32
    cd_item = 2 if compute_dtype == jnp.bfloat16 else 4
    a_h = jnp.asarray(_interp_matrix(H, OH), compute_dtype)       # (OH, H)
    a_wt = jnp.asarray(_interp_matrix(W, OW).T, compute_dtype)    # (W, OW)

    item = x.dtype.itemsize
    in_plane = H * W * item
    out_plane = OH * OW * item
    mat_bytes = (OH * H + W * OW) * cd_item
    vmem_limit = 48 * 1024 * 1024

    # TODO(synk): extremely wide planes (A_w^T alone approaching VMEM/4) would
    # also need tiling of the interpolation matrices; not needed for echofilter.

    if H % 8 == 0 and in_plane + out_plane <= _BLOCK_BUDGET:
        # ---- fast path: fused width pass on a 2-D (NC*H, W) view -----------
        TB = _pick_tb(NC, in_plane + out_plane)
        grid = (NC // TB,)
        flops = NC * (2 * H * W * OW + 2 * OH * H * OW)
        bytes_accessed = NC * (in_plane + out_plane) + mat_bytes

        out = pl.pallas_call(
            _make_fused_width_kernel(TB, H, OH, compute_dtype),
            out_shape=jax.ShapeDtypeStruct((NC * OH, OW), x.dtype),
            grid_spec=pltpu.PrefetchScalarGridSpec(
                num_scalar_prefetch=0,
                grid=grid,
                in_specs=[
                    pl.BlockSpec((OH, H), lambda i: (0, 0)),          # A_h
                    pl.BlockSpec((W, OW), lambda i: (0, 0)),          # A_w^T
                    pl.BlockSpec((TB * H, W), lambda i: (i, 0)),      # TB planes
                ],
                out_specs=pl.BlockSpec((TB * OH, OW), lambda i: (i, 0)),
            ),
            compiler_params=pltpu.CompilerParams(
                dimension_semantics=("parallel",),
                vmem_limit_bytes=vmem_limit,
            ),
            cost_estimate=pl.CostEstimate(
                flops=flops, transcendentals=0, bytes_accessed=bytes_accessed),
        )(a_h, a_wt, x.reshape(NC * H, W))
        return out.reshape(N, C, OH, OW)

    # ---- general path: per-plane matmuls, optional OH tiling ---------------
    T_OH = _pick_oh_tile(OH, OW * item, in_plane)
    TB = _pick_tb(NC, in_plane + T_OH * OW * item)
    grid = (NC // TB, OH // T_OH)
    flops = NC * (2 * OH * H * W + 2 * OH * W * OW)
    bytes_accessed = NC * (in_plane + out_plane) + mat_bytes

    out = pl.pallas_call(
        _make_per_plane_kernel(TB, compute_dtype),
        out_shape=jax.ShapeDtypeStruct((NC, OH, OW), x.dtype),
        grid_spec=pltpu.PrefetchScalarGridSpec(
            num_scalar_prefetch=0,
            grid=grid,
            in_specs=[
                pl.BlockSpec((T_OH, H), lambda i, j: (j, 0)),         # A_h tile
                pl.BlockSpec((W, OW), lambda i, j: (0, 0)),           # A_w^T
                pl.BlockSpec((TB, H, W), lambda i, j: (i, 0, 0)),     # TB planes
            ],
            out_specs=pl.BlockSpec((TB, T_OH, OW), lambda i, j: (i, j, 0)),
        ),
        compiler_params=pltpu.CompilerParams(
            dimension_semantics=("parallel", "arbitrary"),
            vmem_limit_bytes=vmem_limit,
        ),
        cost_estimate=pl.CostEstimate(
            flops=flops, transcendentals=0, bytes_accessed=bytes_accessed),
    )(a_h, a_wt, x.reshape(NC, H, W))
    return out.reshape(N, C, OH, OW)


def up_bilinear_2x(x: jnp.ndarray) -> jnp.ndarray:
    """Default Up() configuration: upsample 2x in both spatial dims."""
    return up_bilinear(x, up_dims=(True, True))


# TODO(synk): mode='conv' (ConvTranspose2d) branch of Up is not implemented;
# the default constructor arguments select the bilinear Upsample path above.


if __name__ == "__main__":
    key = jax.random.PRNGKey(0)

    def ref_upsample(xin, oh, ow):
        h, w = xin.shape[-2:]
        ah = _interp_matrix(h, oh).astype(np.float64)
        aw = _interp_matrix(w, ow).astype(np.float64)
        xf = np.asarray(xin).astype(np.float64)
        return np.einsum("oh,nchw,pw->ncop", ah, xf, aw).astype(np.float32)

    # Default Up() at a small NCHW shape (fast path).
    x = jax.random.normal(key, (2, 4, 16, 16), dtype=jnp.float32)
    y = up_bilinear_2x(x)
    jax.block_until_ready(y)
    ref = ref_upsample(x, 32, 32)
    assert y.shape == (2, 4, 32, 32)
    assert y.dtype == x.dtype
    # Tolerance leaves headroom for MXU f32 matmul precision across TPU gens.
    assert np.allclose(np.asarray(y), ref, atol=5e-2, rtol=1e-2)

    # bf16 path: native dtype in/out, bf16 MXU matmuls (loose tolerance).
    xb16 = x.astype(jnp.bfloat16)
    yb16 = up_bilinear_2x(xb16)
    jax.block_until_ready(yb16)
    assert yb16.shape == (2, 4, 32, 32)
    assert yb16.dtype == jnp.bfloat16
    assert np.allclose(np.asarray(yb16.astype(jnp.float32)), ref, atol=0.25, rtol=0.05)

    # General (per-plane) path: H not a multiple of 8.
    x2 = jax.random.normal(jax.random.PRNGKey(1), (1, 3, 12, 20), dtype=jnp.float32)
    y2 = up_bilinear_2x(x2)
    jax.block_until_ready(y2)
    ref2 = ref_upsample(x2, 24, 40)
    assert y2.shape == (1, 3, 24, 40)
    assert np.allclose(np.asarray(y2), ref2, atol=5e-2, rtol=1e-2)

    print("KERNEL_OK")
</pallas_src>

<mosaic_0001>
module attributes {stable_mosaic.version = 11 : i64} {
  func.func @kernel(%arg0: i32, %arg1: memref<32x16xf32, #tpu.memory_space<vmem>>, %arg2: memref<16x32xf32, #tpu.memory_space<vmem>>, %arg3: memref<32x16xf32, #tpu.memory_space<vmem>>, %arg4: memref<64x32xf32, #tpu.memory_space<vmem>>) attributes {dimension_semantics = [#tpu.dimension_semantics<parallel>], iteration_bounds = array<i64: 4>, scalar_prefetch = 0 : i64, scratch_operands = 0 : i64, tpu.core_type = #tpu.core_type<tc>, window_params = [{pipeline_mode = #tpu.pipeline_mode<synchronous>, transform_indices = @transform_0, window_bounds = array<i64: 32, 16>}, {pipeline_mode = #tpu.pipeline_mode<synchronous>, transform_indices = @transform_1, window_bounds = array<i64: 16, 32>}, {transform_indices = @transform_2, window_bounds = array<i64: 32, 16>}, {transform_indices = @transform_3, window_bounds = array<i64: 64, 32>}]} {
    %c0 = arith.constant 0 : index
    %c0_0 = arith.constant 0 : index
    %0 = vector.load %arg3[%c0, %c0_0] : memref<32x16xf32, #tpu.memory_space<vmem>>, vector<32x16xf32>
    %c0_1 = arith.constant 0 : index
    %c0_2 = arith.constant 0 : index
    %1 = vector.load %arg2[%c0_1, %c0_2] : memref<16x32xf32, #tpu.memory_space<vmem>>, vector<16x32xf32>
    %cst = arith.constant dense<0.000000e+00> : vector<32x32xf32>
    %2 = tpu.matmul %0, %1, %cst {dimension_numbers = #tpu.dot_dimension_numbers<[1], [0], [0], [1], [0, 0, 1, 1], [], []>} : vector<32x16xf32>, vector<16x32xf32>, vector<32x32xf32> -> vector<32x32xf32>
    %c0_3 = arith.constant 0 : index
    %c0_4 = arith.constant 0 : index
    %3 = vector.load %arg1[%c0_3, %c0_4] : memref<32x16xf32, #tpu.memory_space<vmem>>, vector<32x16xf32>
    %4 = vector.extract_strided_slice %2 {offsets = [0, 0], sizes = [16, 32], strides = [1, 1]} : vector<32x32xf32> to vector<16x32xf32>
    %cst_5 = arith.constant dense<0.000000e+00> : vector<32x32xf32>
    %5 = tpu.matmul %3, %4, %cst_5 {dimension_numbers = #tpu.dot_dimension_numbers<[1], [0], [0], [1], [0, 0, 1, 1], [], []>} : vector<32x16xf32>, vector<16x32xf32>, vector<32x32xf32> -> vector<32x32xf32>
    %c0_6 = arith.constant 0 : index
    %c0_7 = arith.constant 0 : index
    %6 = vector.load %arg4[%c0_6, %c0_7] : memref<64x32xf32, #tpu.memory_space<vmem>>, vector<32x32xf32>
    tpu.vector_store %arg4[%c0_6, %c0_7], %5 {strides = array<i32>} : memref<64x32xf32, #tpu.memory_space<vmem>>, vector<32x32xf32>,
    %7 = vector.extract_strided_slice %2 {offsets = [16, 0], sizes = [16, 32], strides = [1, 1]} : vector<32x32xf32> to vector<16x32xf32>
    %cst_8 = arith.constant dense<0.000000e+00> : vector<32x32xf32>
    %8 = tpu.matmul %3, %7, %cst_8 {dimension_numbers = #tpu.dot_dimension_numbers<[1], [0], [0], [1], [0, 0, 1, 1], [], []>} : vector<32x16xf32>, vector<16x32xf32>, vector<32x32xf32> -> vector<32x32xf32>
    %c32 = arith.constant 32 : index
    %c0_9 = arith.constant 0 : index
    %9 = vector.load %arg4[%c32, %c0_9] : memref<64x32xf32, #tpu.memory_space<vmem>>, vector<32x32xf32>
    tpu.vector_store %arg4[%c32, %c0_9], %8 {strides = array<i32>} : memref<64x32xf32, #tpu.memory_space<vmem>>, vector<32x32xf32>,
    return
  }
  func.func @transform_0(%arg0: i32) -> (i32, i32) {
    %c0_i32 = arith.constant 0 : i32
    %c0_i32_0 = arith.constant 0 : i32
    %c0_i32_1 = arith.constant 0 : i32
    return %c0_i32, %c0_i32_0 : i32, i32
  }
  func.func @transform_1(%arg0: i32) -> (i32, i32) {
    %c0_i32 = arith.constant 0 : i32
    %c0_i32_0 = arith.constant 0 : i32
    %c0_i32_1 = arith.constant 0 : i32
    return %c0_i32, %c0_i32_0 : i32, i32
  }
  func.func @transform_2(%arg0: i32) -> (i32, i32) {
    %c0_i32 = arith.constant 0 : i32
    %c0_i32_0 = arith.constant 0 : i32
    return %arg0, %c0_i32 : i32, i32
  }
  func.func @transform_3(%arg0: i32) -> (i32, i32) {
    %c0_i32 = arith.constant 0 : i32
    %c0_i32_0 = arith.constant 0 : i32
    return %arg0, %c0_i32 : i32, i32
  }
}

</mosaic_0001>

<bundles_post_ra>
// kernel: up_bilinear.1
= control target key start
LH: loop header
LB: loop body
LE: loop exit
PB: predicated region body
PF: predicated region fallthrough
CT: control target
= control target key end

     0   :  { %8 = vsyncpa [#allocation3], 0  ;;  %s1237_s0 = inlined_call_operand.hbm [shape: f32[32,16], index: 0, kind: input, shape index: {}]   ;;  %s1238_s1 = inlined_call_operand.hbm [shape: f32[16,32], index: 1, kind: input, shape index: {}]   ;;  %s1239_s2 = inlined_call_operand.hbm [shape: f32[128,16], index: 2, kind: input, shape index: {}]   ;;  %s1240_s3 = inlined_call_operand.hbm [shape: f32[256,32], index: 3, kind: output, shape index: {}]  }
   0x1   :  { %9 = vsyncpa [#allocation6], 0 }
   0x2   :  { %10 = vsyncpa [#allocation4], 0 }
   0x3   :  { %12 = vsyncpa [#allocation4 + $0x1], 0  ;;  %s978_s12 = smov 0   ;;  %s980_s13 = smov 0  }
   0x4   :  { %s982_s14 = smov 0   ;;  %s984_s15 = smov 0  }
   0x5 LB: > { %s999_s16 = sadd.s32 4294967295, %s948_s15   ;;  %s623_s17 = sadd.s32 4294967294, %s948_s15   ;;  %s948_s15 = sphi %s984_s15, %s1267_s15   ;;  %s944_s14 = sphi %s982_s14, %s1266_s14   ;;  %s940_s13 = sphi %s980_s13, %s1265_s13   ;;  %s936_s12 = sphi %s978_s12, %s1264_s12  }
   0x6   : > { %s1003_s18 = sadd.s32 1, %s948_s15   ;;  %s67_s19 = sadd.s32 1, %s944_s14 }
   0x7   : > { %s64_s20 = ssub.s32 %s948_s15, %s1003_s18  ;;  %p74_p0 = scmp.ne.s32.totalorder %s944_s14, %s940_s13 }
   0x8   : > { %p65_p1 = scmp.eq.s32.totalorder %s64_s20, 0  ;;  %p75_p2 = scmp.eq.s32.totalorder %s948_s15, 0 }
   0x9   : > { %p80_p3 = scmp.ne.s32.totalorder %s940_s13, %s936_s12  ;;  %p1241_p4 = scmp.eq.s32.totalorder %s999_s16, 0 }
   0xa   : > { %s1015_s21 = scalar_select %p65_p1, %s944_s14, %s67_s19  }
   0xb   : > { %p1017_p5 = por %p75_p2, %p74_p0  ;;  %p1023_p6 = por %p1241_p4, %p80_p3 }
   0xc   : > { %p104_p7 = scmp.eq.s32.totalorder %s999_s16, 3  ;;  %p110_p8 = scmp.eq.s32.totalorder %s623_s17, 3 }
   0xd   : > { %s1246_s22 = scalar_select %p1017_p5, 1, 0 }
   0xe   : > { %s1247_s23 = scalar_select %p1023_p6, 1, 0 }
   0xf   : > { %p624_p9 = scmp.ge.s32.totalorder %s948_s15, 1  ;;  %p117_p10 = scmp.lt.s32.totalorder %s948_s15, 5 }
  0x10   : > { %p1030_p11 = por %p104_p7, %p74_p0  ;;  %p1034_p12 = por %p110_p8, %p80_p3 }
  0x11   : > { %p1038_p13 = pnand %p624_p9, %p117_p10  ;;  %s950_s27 = smov [#allocation2]  }
  0x12   : > { %s1248_s24 = scalar_select %p1030_p11, 1, 0 }
  0x13   : > { %s1249_s25 = scalar_select %p1034_p12, 1, 0 }
  0x14   : > { %s1250_s26 = scalar_select %p1038_p13, 1, 0 }
  0x15   : > { %p729_p1 = pneg %p1038_p13  ;;  %s129_s28 = sshll.u32 %s950_s27, 4  ;;  %s130_s28 = int_to_ptr.vmem [resolvable:$true] %s129_s28 }
  0x16   : > { %s951_s30 = smov [#allocation5]   ;;  %s788_s7 = scalar_lea.hbm %s1237_s0, 512 }
  0x17   : > { %p1046_p2 = pnand %p729_p1, %p1241_p4  ;;  %s142_s4 = sshll.u32 %s951_s30, 4  ;;  %s143_s4 = int_to_ptr.vmem [resolvable:$true] %s142_s4 }
  0x18   : > { %p789_p3 = scmp.ne.s32.totalorder %s1237_s0, %s788_s7  ;;  %p795_p10 = scmp.lt.u32.totalorder %s788_s7, %s1237_s0 }
  0x19   : > { %p790_p7 = pneg %p1046_p2 }
  0x1b   : > { %p791_p8 = pnand %p790_p7, %p789_p3 }
  0x1d   : > { %p792_p9 = pneg %p791_p8 }
  0x1f   : > { %p797_p1 = pnand %p795_p10, %p792_p9 }
  0x21   : > { %800 = shalt.err (!%p797_p1)
}
  0x22   : > { %s801_s17 = scalar_lea.vmem %s130_s28, 512  ;;  %p809_p11 = scmp.lt.s32.totalorder %s130_s28, %s130_s28 }
  0x23   : > { %p802_p4 = scmp.ne.s32.totalorder %s130_s28, %s801_s17  ;;  %p810_p6 = scmp.lt.s32.totalorder %s801_s17, %s801_s17 }
  0x25   : > { %p804_p0 = pnand %p802_p4, %p790_p7  ;;  %p811_p13 = por %p810_p6, %p809_p11 }
  0x27   : > { %p805_p12 = pneg %p804_p0 }
  0x29   : > { %p812_p5 = pnand %p811_p13, %p805_p12 }
  0x2b   : > { %815 = shalt.err (!%p812_p5)
}
  0x2c   : > { %s952_s19 = smov 128   ;;  %s953_s20 = smov 8  }
  0x2d   : > { %732 = dma.hbm_to_vmem [thread:$0]  (!%p1046_p2), %s1237_s0, 512, %s130_s28, [#allocation3], %s952_s19, %s952_s19, %s953_s20  }
  0x2e   : > { %p1252_p4 = scmp.ne.s32.totalorder %s1246_s22, 0  ;;  %p1253_p0 = scmp.lt.s32.totalorder %s948_s15, 4 }
  0x2f   : > { %s816_s8 = scalar_lea.hbm %s1238_s1, 256 }
  0x30   : > { %p1080_p3 = pnand %p1253_p0, %p1252_p4  ;;  %p817_p5 = scmp.ne.s32.totalorder %s1238_s1, %s816_s8 }
  0x31   : > { %p823_p12 = scmp.lt.u32.totalorder %s816_s8, %s1238_s1 }
  0x32   : > { %s1254_s5 = scalar_select %p1080_p3, 1, 0 }
  0x33   : > { %p819_p6 = pnand %p817_p5, %p790_p7 }
  0x35   : > { %p820_p11 = pneg %p819_p6 }
  0x37   : > { %p825_p13 = pnand %p823_p12, %p820_p11 }
  0x39   : > { %828 = shalt.err (!%p825_p13)
}
  0x3a   : > { %s829_s11 = scalar_lea.vmem %s143_s4, 256  ;;  %p837_p1 = scmp.lt.s32.totalorder %s143_s4, %s143_s4 }
  0x3b   : > { %p830_p8 = scmp.ne.s32.totalorder %s143_s4, %s829_s11  ;;  %p838_p4 = scmp.lt.s32.totalorder %s829_s11, %s829_s11 }
  0x3d   : > { %p832_p9 = pnand %p830_p8, %p790_p7  ;;  %p839_p0 = por %p838_p4, %p837_p1 }
  0x3f   : > { %p833_p10 = pneg %p832_p9 }
  0x41   : > { %p840_p3 = pnand %p839_p0, %p833_p10 }
  0x43   : > { %843 = shalt.err (!%p840_p3)
}
  0x44   : > { %735 = dma.hbm_to_vmem [thread:$0]  (!%p1046_p2), %s1238_s1, 256, %s143_s4, [#allocation6], %s952_s19, %s952_s19, %s953_s20  }
  0x45   : > { %s156_s30 = sand.u32 1, %s948_s15   ;;  %s158_s6 = sand.u32 1, %s944_s14  }
  0x46   : > { %s628_s7 = sshll.u32 %s158_s6, 5  ;;  %s653_s8 = sshll.u32 %s948_s15, 9 }
  0x47   : > { %s1113_s29 = scalar_lea.hbm %s1239_s2, %s653_s8  ;;  %s160_s28 = scalar_lea.vmem [#allocation7], %s628_s7 }
  0x48   : > { %s167_s22 = sshll.u32 %s160_s28, 4  ;;  %s1117_s11 = scalar_lea.sflag [#allocation3], %s156_s30  ;;  %s1115_s22 = int_to_ptr.vmem [resolvable:$true] %s167_s22 }
  0x49   : > { %s844_s4 = scalar_lea.hbm %s1113_s29, 512  ;;  %p1255_p7 = scmp.ne.s32.totalorder %s1254_s5, 0 }
  0x4a   : > { %p845_p2 = scmp.ne.s32.totalorder %s1113_s29, %s844_s4  ;;  %s849_s6 = scalar_lea.hbm %s1239_s2, 2048 }
  0x4b   : > { %p846_p3 = pneg %p1255_p7  ;;  %p850_p11 = scmp.lt.u32.totalorder %s1113_s29, %s1239_s2 }
  0x4c   : > { %p851_p12 = scmp.lt.u32.totalorder %s849_s6, %s844_s4  ;;  %p853_p8 = scmp.lt.u32.totalorder %s844_s4, %s1113_s29 }
  0x4d   : > { %p847_p5 = pnand %p846_p3, %p845_p2 }
  0x4e   : > { %p852_p13 = por %p851_p12, %p850_p11 }
  0x4f   : > { %p848_p6 = pneg %p847_p5 }
  0x50   : > { %p854_p9 = por %p853_p8, %p852_p13 }
  0x52   : > { %p855_p10 = pnand %p854_p9, %p848_p6 }
  0x54   : > { %858 = shalt.err (!%p855_p10)
}
  0x55   : > { %s859_s30 = scalar_lea.vmem %s1115_s22, 512  ;;  %s954_s7 = smov [#allocation7]  }
  0x56   : > { %p860_p1 = scmp.ne.s32.totalorder %s1115_s22, %s859_s30  ;;  %s864_s10 = sshll.u32 %s954_s7, 4  ;;  %s865_s10 = int_to_ptr.vmem [resolvable:$false] %s864_s10 }
  0x57   : > { %s866_s28 = scalar_lea.vmem %s865_s10, 1024  ;;  %p867_p2 = scmp.lt.s32.totalorder %s1115_s22, %s865_s10 }
  0x58   : > { %p862_p4 = pnand %p860_p1, %p846_p3  ;;  %p868_p5 = scmp.lt.s32.totalorder %s866_s28, %s859_s30 }
  0x5a   : > { %p863_p0 = pneg %p862_p4  ;;  %p869_p11 = por %p868_p5, %p867_p2 }
  0x5c   : > { %p870_p12 = pnand %p869_p11, %p863_p0 }
  0x5e   : > { %873 = shalt.err (!%p870_p12)
}
  0x5f   : > { %739 = dma.hbm_to_vmem [thread:$0]  (!%p1255_p7), %s1113_s29, 512, %s1115_s22, %s1117_s11, %s952_s19, %s952_s19, %s953_s20  }
  0x60   : > { %p1256_p3 = scmp.ne.s32.totalorder %s1250_s26, 0 }
  0x61   : > { %p1257_p6 = scmp.eq.s32.totalorder (!%p1256_p3), %s999_s16, 0 }
  0x62   : > { %179 = sbr.rel (%p1256_p3) target bundleno = 572 (0x23c), region = 32 }
  0x69   : > { %919 = dma.done.wait (%p1257_p6), [#allocation3], 512   ;;  %p1258_p13 = pmov %p1257_p6 }
  0x6a   : > { %p1259_p8 = pmov %p1257_p6 }
  0x6b   : > { %921 = vsyncadd (%p1258_p13), [#allocation3], 4294966784 }
  0x6c   : > { %923 = dma.done.wait (%p1259_p8), [#allocation6], 256   ;;  %p1260_p9 = pmov %p1257_p6 }
  0x6d   : > { %s189_s5 = sand.u32 1, %s999_s16   ;;  %s1160_s19 = sand.u32 1, %s940_s13  }
  0x6e   : > { %925 = vsyncadd (%p1260_p9), [#allocation6], 4294967040  ;;  %s634_s26 = sshll.u32 %s1160_s19, 5  ;;  %s190_s20 = scalar_lea.sflag [#allocation3], %s189_s5 }
  0x6f   : > { %s193_s29 = scalar_lea.vmem [#allocation7], %s634_s26  ;;  %p1261_p7 = scmp.ne.s32.totalorder %s1247_s23, 0 }
  0x71   : > { %927 = dma.done.wait (%p1261_p7), %s190_s20, 512  }
  0x72   : > { %929 = vsyncadd (%p1261_p7), %s190_s20, 4294966784  ;;  %vm224_vm0 = vcmask 130048   ;;  %v222_v0 = vld [vmem:[#allocation5] sm:$0xff]  ;;  %v223_v1 = vld [vmem:[#allocation5 + $0x8] sm:$0xff]  ;;  %s635_s23 = sshll.u32 %s1160_s19, 6  ;;  %vm423_vm1 = vcmask 261120  }
  0x73   : > { %v218_v2 = vld [vmem:[%s193_s29] sm:$0xff]  ;;  %v703_v3 = vpack.c.bf16 %v223_v1, %v222_v0  ;;  %v220_v4 = vld [vmem:[%s193_s29 + $0x10] sm:$0xff]  ;;  %v219_v5 = vld [vmem:[%s193_s29 + $0x8] sm:$0xff]  ;;  %s215_s22 = scalar_lea.vmem [#allocation8], %s635_s23  ;;  %s654_s4 = sshll.u32 %s999_s16, 10 }
  0x74   : > { %677 = vmatprep.mubr.msk.f32.mxu0 %vm224_vm0, %v218_v2  ;;  %680 = vmatprep.mubr.msk.f32.mxu1 %vm224_vm0, %v220_v4  ;;  %v221_v6 = vld [vmem:[%s193_s29 + $0x18] sm:$0xff]  ;;  %v322_v7 = vld [vmem:[#allocation2] sm:$0xff]  ;;  %v324_v15 = vld [vmem:[#allocation2 + $0x10] sm:$0xff]  ;;  %s531_s11 = sshll.u32 %s215_s22, 4  ;;  %s1190_s16 = scalar_lea.hbm %s1240_s3, %s654_s4  ;;  %s1183_s11 = int_to_ptr.vmem [resolvable:$true] %s531_s11 }
  0x75   : > { %704 = vmatprep.subr.bf16.mxu0 %v703_v3  ;;  %715 = vmatprep.subr.bf16.mxu1 %v703_v3  ;;  %v323_v14 = vld [vmem:[#allocation2 + $0x8] sm:$0xff]  ;;  %v325_v16 = vld [vmem:[#allocation2 + $0x18] sm:$0xff]  ;;  %s518_s6 = scalar_lea.sflag [#allocation4], %s1160_s19  ;;  %s874_s8 = scalar_lea.vmem %s1183_s11, 1024 }
  0x76   : > { %706 = vmatpush3.bf16.msra.mxu0 %v703_v3  ;;  %716 = vmatpush3.bf16.msra.mxu1 %v703_v3  ;;  %p875_p10 = scmp.ne.s32.totalorder %s1183_s11, %s874_s8  ;;  %p1262_p1 = scmp.ne.s32.totalorder %s1248_s24, 0 }
  0x77   : > { %s955_s9 = smov [#allocation8]  }
  0x78   : > { %p876_p4 = pnand %p875_p10, %p1262_p1  ;;  %s878_s30 = sshll.u32 %s955_s9, 4  ;;  %s879_s30 = int_to_ptr.vmem [resolvable:$false] %s878_s30 }
  0x79   : > { %678 = vmatmul.mubr.msk.f32.vlgmr.msra.gmra.mrb[0].mxu0 %vm224_vm0, %v219_v5  ;;  %681 = vmatmul.mubr.msk.f32.vlgmr.msra.gmra.mrb[0].mxu1 %vm224_vm0, %v221_v6  ;;  %s880_s7 = scalar_lea.vmem %s879_s30, 2048  ;;  %p881_p2 = scmp.lt.s32.totalorder %s1183_s11, %s879_s30 }
  0x7a   : > { %687 = vmatprep.mubr.msk.f32.mxu1 %vm224_vm0, %v322_v7  ;;  %697 = vmatprep.mubr.msk.f32.mxu0 %vm224_vm0, %v322_v7  ;;  %p877_p0 = pneg %p876_p4  ;;  %p882_p5 = scmp.lt.s32.totalorder %s880_s7, %s874_s8 }
  0x7c   : > { %p883_p11 = por %p882_p5, %p881_p2 }
  0x7e   : > { %p884_p12 = pnand %p883_p11, %p877_p0 }
 0x14c   : > { %v679_v8 = vpop.f32.mrb[0].mxu0  ;;  %v682_v9 = vpop.f32.mrb[0].mxu1 }
 0x14d   : > { %v303_v10 = vpop.f32.mrb[1].mxu0  ;;  %v313_v11 = vpop.f32.mrb[1].mxu1 }
 0x14e   : > { %v707_v12 = vpack.c.bf16 %v679_v8, %v303_v10  ;;  %v711_v13 = vpack.c.bf16 %v682_v9, %v313_v11 }
 0x150   : > { %708 = vmatprep.subr.bf16.mxu1 %v707_v12  ;;  %712 = vmatprep.subr.bf16.mxu0 %v711_v13 }
 0x151   : > { %710 = vmatpush3.bf16.msra.mxu1 %v707_v12  ;;  %714 = vmatpush3.bf16.msra.mxu0 %v711_v13 }
 0x154   : > { %688 = vmatmul.mubr.msk.f32.vlgmr.msra.gmra.mrb[2].mxu1 %vm224_vm0, %v323_v14  ;;  %698 = vmatmul.mubr.msk.f32.vlgmr.msra.gmra.mrb[2].mxu0 %vm224_vm0, %v323_v14 }
 0x155   : > { %690 = vmatprep.mubr.msk.f32.mxu1 %vm224_vm0, %v324_v15  ;;  %700 = vmatprep.mubr.msk.f32.mxu0 %vm224_vm0, %v324_v15 }
 0x158   : > { %691 = vmatmul.mubr.msk.f32.gmra.mrb[4].mxu1 %vm224_vm0, %v325_v16  ;;  %701 = vmatmul.mubr.msk.f32.gmra.mrb[4].mxu0 %vm224_vm0, %v325_v16 }
 0x227   : > { %v689_v17 = vpop.f32.mrb[2].mxu1  ;;  %v699_v18 = vpop.f32.mrb[2].mxu0 }
 0x228   : > { %425 = vst.msk [vmem:[%s215_s22 + $0x8] sm:$0xff] %vm423_vm1, %v689_v17  ;;  %514 = vst.msk [vmem:[%s215_s22 + $0x28] sm:$0xff] %vm423_vm1, %v699_v18  ;;  %v404_v19 = vpop.f32.mrb[3].mxu1  ;;  %v494_v20 = vpop.f32.mrb[3].mxu0 }
 0x229   : > { %424 = vst.msk [vmem:[%s215_s22] sm:$0xff] %vm423_vm1, %v404_v19  ;;  %513 = vst.msk [vmem:[%s215_s22 + $0x20] sm:$0xff] %vm423_vm1, %v494_v20 }
 0x22b   : > { %v692_v21 = vpop.f32.mrb[4].mxu1  ;;  %v702_v22 = vpop.f32.mrb[4].mxu0 }
 0x22c   : > { %427 = vst.msk [vmem:[%s215_s22 + $0x18] sm:$0xff] %vm423_vm1, %v692_v21  ;;  %516 = vst.msk [vmem:[%s215_s22 + $0x38] sm:$0xff] %vm423_vm1, %v702_v22  ;;  %v414_v23 = vpop.f32.mrb[5].mxu1  ;;  %v504_v24 = vpop.f32.mrb[5].mxu0 }
 0x22d   : > { %426 = vst.msk [vmem:[%s215_s22 + $0x10] sm:$0xff] %vm423_vm1, %v414_v23  ;;  %515 = vst.msk [vmem:[%s215_s22 + $0x30] sm:$0xff] %vm423_vm1, %v504_v24 }
 0x22e   : > { %887 = shalt.err (!%p884_p12)
}
 0x22f   : > { %s888_s10 = scalar_lea.hbm %s1190_s16, 1024  ;;  %s892_s26 = scalar_lea.hbm %s1240_s3, 4096 }
 0x230   : > { %p889_p3 = scmp.ne.s32.totalorder %s1190_s16, %s888_s10  ;;  %p893_p8 = scmp.lt.u32.totalorder %s1190_s16, %s1240_s3 }
 0x231   : > { %p894_p9 = scmp.lt.u32.totalorder %s892_s26, %s888_s10  ;;  %p896_p10 = scmp.lt.u32.totalorder %s888_s10, %s1190_s16 }
 0x232   : > { %p890_p6 = pnand %p889_p3, %p1262_p1 }
 0x233   : > { %p895_p7 = por %p894_p9, %p893_p8 }
 0x234   : > { %p891_p13 = pneg %p890_p6 }
 0x235   : > { %p897_p4 = por %p896_p10, %p895_p7 }
 0x237   : > { %p898_p0 = pnand %p897_p4, %p891_p13 }
 0x239   : > { %901 = shalt.err (!%p898_p0)
}
 0x23a   : > { %s956_s23 = smov 128   ;;  %s957_s22 = smov 8  }
 0x23b   : > { %727 = dma.vmem_to_hbm [thread:$0]  (%p1262_p1), %s1183_s11, 1024, %s1190_s16, %s518_s6, %s956_s23, %s956_s23, %s957_s22  }
 0x23c PF: > { %p749_p2 = scmp.ge.s32.totalorder %s948_s15, 2  ;;  %s546_s4 = sand.u32 1, %s936_s12  }
 0x23d   : > { %p1263_p5 = scmp.ne.s32.totalorder %s1249_s25, 0  ;;  %s547_s17 = scalar_lea.sflag [#allocation4], %s546_s4 }
 0x23f   : > { %p741_p11 = pnand %p749_p2, %p1263_p5 }
 0x241   : > { %931 = dma.done.wait (!%p741_p11), %s547_s17, 1024  }
 0x242   : > { %933 = vsyncadd (!%p741_p11), %s547_s17, 4294966272  ;;  %p15_p12 = scmp.ge.s32.totalorder %s1003_s18, 6   ;;  %s1264_s12 = smov %s940_s13 }
 0x243   : > { %s1265_s13 = smov %s944_s14  ;;  %s1266_s14 = smov %s1015_s21 }
 0x244   : > { %s1267_s15 = smov %s1003_s18  ;;  %17 = sbr.rel (!%p15_p12) target bundleno = 5 (0x5), region = 84 }
 0x24b   :  { %552 = vsyncpa [#allocation3], 1 }
 0x24c   :  { %554 = vsyncpa [#allocation3 + $0x1], 1 }
 0x24d   :  { %555 = vsyncpa [#allocation6], 1 }
 0x24e   :  { %556 = vsyncpa [#allocation4], 1 }
 0x24f   :  { %558 = vsyncpa [#allocation4 + $0x1], 1 }

</bundles_post_ra>
